<compile_context>
chip_gen: v6e
topology: v6e:2x2x1
jax: 0.10.0
libtpu: 0.0.40
codegen_flags: <defaults>
</compile_context>

<pallas_src>
import jax
import jax.numpy as jnp
from jax.experimental import pallas as pl
from jax.experimental.pallas import tpu as pltpu


def fnn_kernel(x_ref, w1_ref, b1_ref, w2_ref, b2_ref, out_ref):
    # hidden = sigmoid(x @ W1 + b1): canonical (M,K)x(K,N) on the MXU, f32 accumulate,
    # bias add + sigmoid in f32 (sigmoid rides the EUP slot -> effectively free here).
    h = jnp.dot(x_ref[...], w1_ref[...], preferred_element_type=jnp.float32)
    h = jax.nn.sigmoid(h + b1_ref[...])
    # final = sigmoid(hidden @ W2 + b2).  PyTorch runs this layer on hidden.float();
    # h is already f32, the astype only matters when bf16 weight storage is enabled.
    o = jnp.dot(h.astype(w2_ref.dtype), w2_ref[...],
                preferred_element_type=jnp.float32)
    out_ref[...] = jax.nn.sigmoid(o + b2_ref[...]).astype(out_ref.dtype)


def prepare_params(w1, b1, w2, b2, *, param_dtype=jnp.float32):
    """One-time parameter prep (model-init time, NOT per forward call).

    * Transposes the PyTorch [out, in] weights to [in, out] so the kernel runs the
      canonical (M,K)x(K,N) contraction with no in-kernel transpose.
    * Pads the output feature dim up to a multiple of 128 with zero weight columns
      and zero biases so the kernel's output store is lane-dense.
    * Biases stay f32; bias add + sigmoid are always computed in f32.
    * param_dtype=jnp.bfloat16 halves weight VMEM/HBM footprint and uses the
      MXU's native bf16 path (accumulation stays f32) at the cost of ~1e-3-level
      deviation from the f32 PyTorch reference.
    """
    w1 = jnp.asarray(w1, jnp.float32)
    w2 = jnp.asarray(w2, jnp.float32)
    output_dim = w2.shape[0]
    out_padded = ((output_dim + 127) // 128) * 128

    w1t = w1.T.astype(param_dtype)                       # [in, hidden]
    b1r = jnp.asarray(b1, jnp.float32).reshape(1, -1)    # [1, hidden]
    w2t = w2.T.astype(param_dtype)                       # [hidden, out]
    b2r = jnp.asarray(b2, jnp.float32).reshape(1, -1)    # [1, out]
    if out_padded != output_dim:
        w2t = jnp.pad(w2t, ((0, 0), (0, out_padded - output_dim)))
        b2r = jnp.pad(b2r, ((0, 0), (0, out_padded - output_dim)))
    return dict(w1t=w1t, b1=b1r, w2t=w2t, b2=b2r, output_dim=output_dim)


def _choose_batch_tile(batch, block_batch):
    """Batch tile: multiple of 8, divides batch, <= block_batch; prefer >=2 grid
    steps so the "parallel" batch axis can shard across v7x's two TensorCores."""
    if batch % 8 != 0 or batch <= 8:
        return batch  # single full-array block (always a legal block shape)
    tm = min(max(block_batch - block_batch % 8, 8), batch)
    if tm == batch and batch >= 16:
        tm = ((batch // 2 + 7) // 8) * 8  # split so grid_m >= 2 (megacore)
    while batch % tm != 0:
        tm -= 8
    return max(tm, 8)


def fnn_forward(x, params, *, block_batch=512):
    """Forward pass. x: [B, input_dim] -> [B, output_dim] f32."""
    w1t, b1, w2t, b2 = params["w1t"], params["b1"], params["w2t"], params["b2"]
    output_dim = params["output_dim"]
    B, input_dim = x.shape
    hidden_dim = w1t.shape[1]
    out_padded = w2t.shape[1]

    # Cast x to the stored weight dtype (no-op for default f32 params; halves the
    # pipelined x HBM stream when bf16 params are used).
    x = jnp.asarray(x, w1t.dtype)

    tm = _choose_batch_tile(B, block_batch)
    grid_m = pl.cdiv(B, tm)

    # --- explicit VMEM budget -------------------------------------------------
    # Weights/biases are double-buffered by the default pipeline even though their
    # block index never changes, so count them twice.
    # TODO(synk): single-buffer the constant-index weight specs via
    # pipeline_mode=pl.Buffered(1) once that path is robust in the target JAX.
    w_itemsize = jnp.dtype(w1t.dtype).itemsize
    resident = (w1t.size + w2t.size) * w_itemsize + (b1.size + b2.size) * 4
    per_step = tm * input_dim * jnp.dtype(x.dtype).itemsize + tm * out_padded * 4
    hidden_scratch = tm * hidden_dim * 4
    needed = 2 * resident + 2 * per_step + hidden_scratch
    vmem_limit = int(min(max(2 * needed, 32 * 1024 * 1024), 64 * 1024 * 1024))
    # TODO(synk): if `needed` approaches v7x's 64 MiB physical VMEM (huge hidden_dim),
    # shrink block_batch or add an "arbitrary" grid axis tiling hidden_dim with a
    # VMEM f32 accumulator instead of keeping both weight matrices fully resident.

    cost = pl.CostEstimate(
        flops=2 * B * (input_dim * hidden_dim + hidden_dim * out_padded),
        transcendentals=B * (hidden_dim + out_padded),
        bytes_accessed=(x.size * jnp.dtype(x.dtype).itemsize
                        + (w1t.size + w2t.size) * w_itemsize
                        + (b1.size + b2.size) * 4
                        + B * out_padded * 4),
    )

    grid_spec = pltpu.PrefetchScalarGridSpec(
        num_scalar_prefetch=0,
        grid=(grid_m,),
        in_specs=[
            # x tile: pipelined across the batch grid.
            pl.BlockSpec((tm, input_dim), lambda i: (i, 0)),
            # Weights / biases: constant index_map -> fetched once, VMEM-resident.
            pl.BlockSpec((input_dim, hidden_dim), lambda i: (0, 0)),
            pl.BlockSpec((1, hidden_dim), lambda i: (0, 0)),
            pl.BlockSpec((hidden_dim, out_padded), lambda i: (0, 0)),
            pl.BlockSpec((1, out_padded), lambda i: (0, 0)),
        ],
        out_specs=pl.BlockSpec((tm, out_padded), lambda i: (i, 0)),
    )

    out = pl.pallas_call(
        fnn_kernel,
        out_shape=jax.ShapeDtypeStruct((B, out_padded), jnp.float32),
        grid_spec=grid_spec,
        compiler_params=pltpu.CompilerParams(
            # Batch axis is independent -> shardable across TensorCores on v7x.
            dimension_semantics=("parallel",),
            vmem_limit_bytes=vmem_limit,
        ),
        cost_estimate=cost,
    )(x, w1t, b1, w2t, b2)

    # Strip the lane-padding columns (they hold sigmoid(0) = 0.5) back off.
    return out[:, :output_dim] if out_padded != output_dim else out


def _reference(x, w1, b1, w2, b2):
    h = jax.nn.sigmoid(x @ w1.T + b1)
    return jax.nn.sigmoid(h @ w2.T + b2)


if __name__ == "__main__":
    # Small shapes consistent with the module: input_dim -> hidden_dim -> output_dim.
    batch, input_dim, hidden_dim, output_dim = 8, 16, 32, 4

    key = jax.random.PRNGKey(0)
    kx, kw1, kb1, kw2, kb2 = jax.random.split(key, 5)

    x = jax.random.normal(kx, (batch, input_dim), dtype=jnp.float32)

    # Deterministic PyTorch-style uniform(-1/sqrt(fan_in), 1/sqrt(fan_in)) init.
    bound1 = 1.0 / jnp.sqrt(input_dim)
    w1 = jax.random.uniform(kw1, (hidden_dim, input_dim), minval=-bound1, maxval=bound1)
    b1 = jax.random.uniform(kb1, (hidden_dim,), minval=-bound1, maxval=bound1)
    bound2 = 1.0 / jnp.sqrt(hidden_dim)
    w2 = jax.random.uniform(kw2, (output_dim, hidden_dim), minval=-bound2, maxval=bound2)
    b2 = jax.random.uniform(kb2, (output_dim,), minval=-bound2, maxval=bound2)

    # Param prep (transpose / pad / dtype) happens once, outside the forward path.
    params = prepare_params(w1, b1, w2, b2)  # param_dtype=jnp.bfloat16 for MXU-native mode

    out = fnn_forward(x, params)
    out = jax.block_until_ready(out)

    ref = _reference(x, w1, b1, w2, b2)
    assert out.shape == (batch, output_dim)
    assert jnp.allclose(out, ref, atol=1e-5, rtol=1e-5)

    print("KERNEL_OK")
</pallas_src>

<mosaic_0001>
module attributes {stable_mosaic.version = 11 : i64} {
  func.func @fnn_kernel(%arg0: i32, %arg1: memref<8x16xf32, #tpu.memory_space<vmem>>, %arg2: memref<16x32xf32, #tpu.memory_space<vmem>>, %arg3: memref<1x32xf32, #tpu.memory_space<vmem>>, %arg4: memref<32x128xf32, #tpu.memory_space<vmem>>, %arg5: memref<1x128xf32, #tpu.memory_space<vmem>>, %arg6: memref<8x128xf32, #tpu.memory_space<vmem>>) attributes {dimension_semantics = [#tpu.dimension_semantics<parallel>], iteration_bounds = array<i64: 1>, scalar_prefetch = 0 : i64, scratch_operands = 0 : i64, tpu.core_type = #tpu.core_type<tc>, window_params = [{transform_indices = @transform_0, window_bounds = array<i64: 8, 16>}, {pipeline_mode = #tpu.pipeline_mode<synchronous>, transform_indices = @transform_1, window_bounds = array<i64: 16, 32>}, {pipeline_mode = #tpu.pipeline_mode<synchronous>, transform_indices = @transform_2, window_bounds = array<i64: 1, 32>}, {pipeline_mode = #tpu.pipeline_mode<synchronous>, transform_indices = @transform_3, window_bounds = array<i64: 32, 128>}, {pipeline_mode = #tpu.pipeline_mode<synchronous>, transform_indices = @transform_4, window_bounds = array<i64: 1, 128>}, {transform_indices = @transform_5, window_bounds = array<i64: 8, 128>}]} {
    %c0 = arith.constant 0 : index
    %c0_0 = arith.constant 0 : index
    %0 = vector.load %arg1[%c0, %c0_0] : memref<8x16xf32, #tpu.memory_space<vmem>>, vector<8x16xf32>
    %c0_1 = arith.constant 0 : index
    %c0_2 = arith.constant 0 : index
    %1 = vector.load %arg2[%c0_1, %c0_2] : memref<16x32xf32, #tpu.memory_space<vmem>>, vector<16x32xf32>
    %cst = arith.constant dense<0.000000e+00> : vector<8x32xf32>
    %2 = tpu.matmul %0, %1, %cst {dimension_numbers = #tpu.dot_dimension_numbers<[1], [0], [0], [1], [0, 0, 1, 1], [], []>} : vector<8x16xf32>, vector<16x32xf32>, vector<8x32xf32> -> vector<8x32xf32>
    %c0_3 = arith.constant 0 : index
    %c0_4 = arith.constant 0 : index
    %3 = vector.load %arg3[%c0_3, %c0_4] : memref<1x32xf32, #tpu.memory_space<vmem>>, vector<1x32xf32>
    %4 = vector.broadcast %3 : vector<1x32xf32> to vector<8x32xf32>
    %5 = arith.addf %2, %4 : vector<8x32xf32>
    %6 = arith.negf %5 : vector<8x32xf32>
    %7 = math.exp %6 : vector<8x32xf32>
    %cst_5 = arith.constant 1.000000e+00 : f32
    %8 = vector.broadcast %cst_5 : f32 to vector<8x32xf32>
    %9 = arith.addf %8, %7 : vector<8x32xf32>
    %10 = arith.divf %8, %9 : vector<8x32xf32>
    %c0_6 = arith.constant 0 : index
    %c0_7 = arith.constant 0 : index
    %11 = vector.load %arg4[%c0_6, %c0_7] : memref<32x128xf32, #tpu.memory_space<vmem>>, vector<32x128xf32>
    %cst_8 = arith.constant dense<0.000000e+00> : vector<8x128xf32>
    %12 = tpu.matmul %10, %11, %cst_8 {dimension_numbers = #tpu.dot_dimension_numbers<[1], [0], [0], [1], [0, 0, 1, 1], [], []>} : vector<8x32xf32>, vector<32x128xf32>, vector<8x128xf32> -> vector<8x128xf32>
    %c0_9 = arith.constant 0 : index
    %c0_10 = arith.constant 0 : index
    %13 = vector.load %arg5[%c0_9, %c0_10] : memref<1x128xf32, #tpu.memory_space<vmem>>, vector<1x128xf32>
    %14 = vector.broadcast %13 : vector<1x128xf32> to vector<8x128xf32>
    %15 = arith.addf %12, %14 : vector<8x128xf32>
    %16 = arith.negf %15 : vector<8x128xf32>
    %17 = math.exp %16 : vector<8x128xf32>
    %cst_11 = arith.constant 1.000000e+00 : f32
    %18 = vector.broadcast %cst_11 : f32 to vector<8x128xf32>
    %19 = arith.addf %18, %17 : vector<8x128xf32>
    %20 = arith.divf %18, %19 : vector<8x128xf32>
    %c0_12 = arith.constant 0 : index
    %c0_13 = arith.constant 0 : index
    %21 = vector.load %arg6[%c0_12, %c0_13] : memref<8x128xf32, #tpu.memory_space<vmem>>, vector<8x128xf32>
    tpu.vector_store %arg6[%c0_12, %c0_13], %20 {strides = array<i32>} : memref<8x128xf32, #tpu.memory_space<vmem>>, vector<8x128xf32>,
    return
  }
  func.func @transform_0(%arg0: i32) -> (i32, i32) {
    %c0_i32 = arith.constant 0 : i32
    %c0_i32_0 = arith.constant 0 : i32
    return %arg0, %c0_i32 : i32, i32
  }
  func.func @transform_1(%arg0: i32) -> (i32, i32) {
    %c0_i32 = arith.constant 0 : i32
    %c0_i32_0 = arith.constant 0 : i32
    %c0_i32_1 = arith.constant 0 : i32
    return %c0_i32, %c0_i32_0 : i32, i32
  }
  func.func @transform_2(%arg0: i32) -> (i32, i32) {
    %c0_i32 = arith.constant 0 : i32
    %c0_i32_0 = arith.constant 0 : i32
    %c0_i32_1 = arith.constant 0 : i32
    return %c0_i32, %c0_i32_0 : i32, i32
  }
  func.func @transform_3(%arg0: i32) -> (i32, i32) {
    %c0_i32 = arith.constant 0 : i32
    %c0_i32_0 = arith.constant 0 : i32
    %c0_i32_1 = arith.constant 0 : i32
    return %c0_i32, %c0_i32_0 : i32, i32
  }
  func.func @transform_4(%arg0: i32) -> (i32, i32) {
    %c0_i32 = arith.constant 0 : i32
    %c0_i32_0 = arith.constant 0 : i32
    %c0_i32_1 = arith.constant 0 : i32
    return %c0_i32, %c0_i32_0 : i32, i32
  }
  func.func @transform_5(%arg0: i32) -> (i32, i32) {
    %c0_i32 = arith.constant 0 : i32
    %c0_i32_0 = arith.constant 0 : i32
    return %arg0, %c0_i32 : i32, i32
  }
}

</mosaic_0001>

<bundles_post_ra>
// kernel: tpu_custom_call.1
= control target key start
LH: loop header
LB: loop body
LE: loop exit
PB: predicated region body
PF: predicated region fallthrough
CT: control target
= control target key end

     0   :  { %10 = vsyncpa [#allocation3], 0  ;;  %s448_s0 = inlined_call_operand.hbm [shape: f32[8,16], index: 0, kind: input, shape index: {}]   ;;  %s449_s1 = inlined_call_operand.hbm [shape: f32[16,32], index: 1, kind: input, shape index: {}]   ;;  %s450_s2 = inlined_call_operand.vmem [shape: f32[1,32], index: 2, kind: input, shape index: {}]   ;;  %s451_s3 = inlined_call_operand.hbm [shape: f32[32,128], index: 3, kind: input, shape index: {}]   ;;  %s452_s4 = inlined_call_operand.vmem [shape: f32[1,128], index: 4, kind: input, shape index: {}]   ;;  %s453_s5 = inlined_call_operand.hbm [shape: f32[8,128], index: 5, kind: output, shape index: {}]  }
   0x1   :  { %11 = vsyncpa [#allocation6], 0 }
   0x2   :  { %12 = vsyncpa [#allocation4], 0  ;;  %s392_s18 = smov [#allocation5]  }
   0x3   :  { %s28_s19 = sshll.u32 %s392_s18, 4  ;;  %s29_s19 = int_to_ptr.vmem [resolvable:$true] %s28_s19 }
   0x4   :  { %s314_s20 = scalar_lea.vmem %s29_s19, 256  ;;  %p319_p1 = scmp.lt.s32.totalorder %s29_s19, %s29_s19 }
   0x5   :  { %p315_p0 = scmp.ne.s32.totalorder %s29_s19, %s314_s20  ;;  %p320_p2 = scmp.lt.s32.totalorder %s314_s20, %s314_s20 }
   0x7   :  { %p321_p3 = por %p320_p2, %p319_p1 }
   0x9   :  { %p322_p4 = pnand %p321_p3, %p315_p0 }
   0xb   :  { %325 = shalt.err (!%p322_p4)
}
   0xc   :  { %s393_s21 = smov 128   ;;  %s394_s22 = smov 8  }
   0xd   :  { %34 = dma.hbm_to_vmem [thread:$0]  %s449_s1, 256, %s29_s19, [#allocation6], %s393_s21, %s393_s21, %s394_s22  }
   0xe   :  { %s395_s25 = smov [#allocation2]   ;;  %s396_s27 = smov [#allocation7]  }
   0xf   :  { %s19_s26 = sshll.u32 %s395_s25, 4  ;;  %s42_s28 = sshll.u32 %s396_s27, 4  ;;  %s20_s26 = int_to_ptr.vmem [resolvable:$true] %s19_s26  ;;  %s43_s28 = int_to_ptr.vmem [resolvable:$true] %s42_s28 }
  0x10   :  { %s334_s29 = scalar_lea.vmem %s20_s26, 128  ;;  %p339_p6 = scmp.lt.s32.totalorder %s20_s26, %s20_s26 }
  0x11   :  { %p335_p5 = scmp.ne.s32.totalorder %s20_s26, %s334_s29  ;;  %p340_p7 = scmp.lt.s32.totalorder %s334_s29, %s334_s29 }
  0x13   :  { %p341_p8 = por %p340_p7, %p339_p6 }
  0x15   :  { %p342_p9 = pnand %p341_p8, %p335_p5 }
  0x17   :  { %345 = shalt.err (!%p342_p9)
}
  0x18   :  { %22 = dma.hbm_to_vmem [thread:$0]  %s448_s0, 128, %s20_s26, [#allocation3]  }
  0x19   :  { %s354_s7 = scalar_lea.vmem %s43_s28, 512  ;;  %p359_p11 = scmp.lt.s32.totalorder %s43_s28, %s43_s28 }
  0x1a   :  { %p355_p10 = scmp.ne.s32.totalorder %s43_s28, %s354_s7  ;;  %p360_p12 = scmp.lt.s32.totalorder %s354_s7, %s354_s7 }
  0x1c   :  { %p361_p13 = por %p360_p12, %p359_p11 }
  0x1e   :  { %p362_p0 = pnand %p361_p13, %p355_p10 }
  0x20   :  { %365 = shalt.err (!%p362_p0)
}
  0x21   :  { %48 = dma.hbm_to_vmem [thread:$0]  %s451_s3, 512, %s43_s28, [#allocation6], %s393_s21, %s393_s21, %s394_s22  }
  0x22   :  { %386 = dma.done.wait [#allocation3], 128  }
  0x23   :  { %387 = vsyncadd [#allocation3], 4294967168 }
  0x24   :  { %388 = dma.done.wait [#allocation6], 768  }
  0x25   :  { %389 = vsyncadd [#allocation6], 4294966528  ;;  %v397_v0 = vmov 0.0   ;;  %vm398_vm0 = vmmov 0   ;;  %v62_v1 = vld [vmem:[#allocation5 + $0x8] sm:$0xff]  ;;  %v61_v2 = vld [vmem:[#allocation5] sm:$0xff] }
  0x26   :  { %272 = vmatprep.subr.mxu0 %v397_v0  ;;  %276 = vmatprep.mubr.msk.f32.mxu0 %vm398_vm0, %v397_v0  ;;  %v60_v3 = vld [vmem:[#allocation2] sm:$0xff]  ;;  %vm70_vm1 = vcmask 130048   ;;  %v153_v4 = vld [vmem:[#allocation7 + $0x18] sm:$0xff]  ;;  %v152_v5 = vld [vmem:[#allocation7 + $0x10] sm:$0xff]  ;;  %vm161_vm2 = vcmask 261120  }
  0x27   :  { %279 = vmatprep.subr.mxu1 %v397_v0  ;;  %287 = vmatprep.mubr.msk.f32.mxu1 %vm398_vm0, %v397_v0  ;;  %v151_v6 = vld [vmem:[#allocation7 + $0x8] sm:$0xff]  ;;  %v150_v7 = vld [vmem:[#allocation7] sm:$0xff] }
  0x28   :  { %273 = vmatpush3.msra.mxu0 %v62_v1  ;;  %280 = vmatpush3.msra.mxu1 %v153_v4  ;;  %v258_v8 = vld [vmem:[%s450_s2] ss:$0 sm:$0xff]  ;;  %s399_s2 = smov [#allocation8]  }
  0x29   :  { %274 = vmatprep.subr.mxu0 %v397_v0  ;;  %281 = vmatprep.subr.mxu1 %v397_v0  ;;  %v261_v16 = vld [vmem:[%s452_s4] ss:$0 sm:$0xff]  ;;  %s248_s11 = sshll.u32 %s399_s2, 4  ;;  %s249_s11 = int_to_ptr.vmem [resolvable:$true] %s248_s11 }
  0x2a   :  { %275 = vmatpush3.msra.mxu0 %v61_v2  ;;  %282 = vmatpush3.msra.mxu1 %v152_v5  ;;  %s366_s12 = scalar_lea.vmem %s249_s11, 128  ;;  %p371_p2 = scmp.lt.s32.totalorder %s249_s11, %s249_s11 }
  0x2b   :  { %277 = vmatmul.mubr.msk.f32.vlgmr.msra.gmra.mxu0 %vm70_vm1, %v60_v3  ;;  %283 = vmatprep.subr.mxu1 %v397_v0  ;;  %p367_p1 = scmp.ne.s32.totalorder %s249_s11, %s366_s12  ;;  %p372_p3 = scmp.lt.s32.totalorder %s366_s12, %s366_s12 }
  0x2c   :  { %284 = vmatpush3.msra.mxu1 %v151_v6 }
  0x2d   :  { %285 = vmatprep.subr.mxu1 %v397_v0  ;;  %p373_p4 = por %p372_p3, %p371_p2 }
  0x2e   :  { %286 = vmatpush3.msra.mxu1 %v150_v7 }
  0x2f   :  { %p374_p5 = pnand %p373_p4, %p367_p1 }
  0xeb   :  { %v140_v9 = vpop.f32.mrf.mxu0 }
  0xec   :  { %v141_v10 = vadd.f32 %v258_v8, %v140_v9 }
  0xed   :  { %v278_v11 = vpop.f32.mrf.mxu0 }
  0xee   :  { %v260_v12 = vmul.f32 -1.442695, %v141_v10 }
  0xf0   :  { %298 = vpow2.f32 %v260_v12 }
  0xfd   :  { %v299_v13 = vpop.eup %298 }
  0xfe   :  { %v147_v14 = vadd.f32 1.0, %v299_v13 }
 0x100   :  { %300 = vrcp.f32 %v147_v14 }
 0x10d   :  { %v301_v15 = vpop.eup %300 }
 0x10e   :  { %288 = vmatmul.mubr.msk.f32.vlgmr.msra.gmra.mxu1 %vm161_vm2, %v301_v15 }
 0x1ce   :  { %v231_v17 = vpop.f32.mrf.mxu1 }
 0x1cf   :  { %v232_v18 = vadd.f32 %v261_v16, %v231_v17 }
 0x1d0   :  { %v289_v19 = vpop.f32.mrf.mxu1 }
 0x1d1   :  { %v263_v20 = vmul.f32 -1.442695, %v232_v18 }
 0x1d3   :  { %302 = vpow2.f32 %v263_v20 }
 0x1e0   :  { %v303_v21 = vpop.eup %302 }
 0x1e1   :  { %v238_v22 = vadd.f32 1.0, %v303_v21 }
 0x1e3   :  { %304 = vrcp.f32 %v238_v22 }
 0x1f0   :  { %v305_v23 = vpop.eup %304 }
 0x1f1   :  { %241 = vst [vmem:[#allocation8] sm:$0xff] %v305_v23 }
 0x1f2   :  { %377 = shalt.err (!%p374_p5)
}
 0x1f3   :  { %251 = dma.vmem_to_hbm [thread:$0]  %s249_s11, 128, %s453_s5, [#allocation4]  }
 0x1f4   :  { %390 = dma.done.wait [#allocation4], 128  }
 0x1f5   :  { %391 = vsyncadd [#allocation4], 4294967168 }
 0x1f6   :  { %255 = vsyncpa [#allocation3], 1 }
 0x1f7   :  { %256 = vsyncpa [#allocation6], 1 }
 0x1f8   :  { %257 = vsyncpa [#allocation4], 1 }

</bundles_post_ra>
